<compile_context>
chip_gen: v7x
topology: tpu7x:2x2x1
jax: 0.10.0
libtpu: 0.0.40
codegen_flags: <defaults>
</compile_context>

<pallas_src>
import jax
import jax.numpy as jnp
from jax.experimental import pallas as pl
from jax.experimental.pallas import tpu as pltpu

LANE = 128  # vreg lane width


def convnet_kernel(x_ref, w1_ref, wc_ref, bias_ref, b3_ref, y_ref):
    # Packed bias/fc3 buffer (f32, lane-padded):
    #   row 0: fc1 bias (hidden, zero-padded)
    #   row 1: conv bias (C_out, zero-padded)
    #   row 2: fc3 weight row (C_out, zero-padded)
    b1 = bias_ref[0:1, :]
    bc = bias_ref[1:2, :]
    w3 = bias_ref[2:3, :]
    b3 = b3_ref[0, 0]  # scalar fc3 bias from SMEM

    # fc1 + relu  (bf16 operands -> f32 accumulate on the MXU)
    h1 = jnp.dot(x_ref[...], w1_ref[...], preferred_element_type=jnp.float32)
    h1 = jnp.maximum(h1 + b1, 0.0)

    # conv2 degenerates to a dense layer (1x1 spatial output) + relu
    h2 = jnp.dot(h1.astype(jnp.bfloat16), wc_ref[...],
                 preferred_element_type=jnp.float32)
    h2 = jnp.maximum(h2 + bc, 0.0)

    # fc3: width-1 output -> elementwise mul (VPU) + lane reduction (XLU).
    # Padded lanes of h2 and w3 are zero, so they do not contribute.
    y_ref[...] = jnp.sum(h2 * w3, axis=-1, keepdims=True) + b3


def convnet_forward(x_bf, w1p, wcp, biases, b3, *, tile_b=128):
    """x_bf: (B, input_size) bf16.  Returns (B, 1) f32."""
    B, input_size = x_bf.shape
    hp = w1p.shape[1]   # padded hidden (128)
    cp = wcp.shape[1]   # padded C_out  (128)
    assert B % tile_b == 0

    flops = B * (2 * input_size * hp + 2 * hp * cp + 2 * cp)
    bytes_accessed = (x_bf.size * 2 + w1p.size * 2 + wcp.size * 2
                      + biases.size * 4 + 4 + B * 4)

    return pl.pallas_call(
        convnet_kernel,
        out_shape=jax.ShapeDtypeStruct((B, 1), jnp.float32),
        grid_spec=pltpu.PrefetchScalarGridSpec(
            num_scalar_prefetch=0,
            grid=(B // tile_b,),
            in_specs=[
                # x: tiled over the batch (double-buffered per grid step)
                pl.BlockSpec((tile_b, input_size), lambda i: (i, 0)),
                # weights / packed biases: constant block index -> stay resident
                pl.BlockSpec((input_size, hp), lambda i: (0, 0)),
                pl.BlockSpec((hp, cp), lambda i: (0, 0)),
                pl.BlockSpec((3, cp), lambda i: (0, 0)),
                # scalar fc3 bias in SMEM
                pl.BlockSpec((1, 1), lambda i: (0, 0),
                             memory_space=pltpu.MemorySpace.SMEM),
            ],
            out_specs=pl.BlockSpec((tile_b, 1), lambda i: (i, 0)),
        ),
        compiler_params=pltpu.CompilerParams(
            dimension_semantics=("parallel",)),
        cost_estimate=pl.CostEstimate(
            flops=flops, transcendentals=0, bytes_accessed=bytes_accessed),
    )(x_bf, w1p, wcp, biases, b3)


if __name__ == "__main__":
    # Shapes consistent with the module (fc1 output reshapes to (C_in, k, k)).
    input_size = 32
    in_channels = 4
    out_channels = 8
    kernel_size = 4
    hidden = in_channels * kernel_size * kernel_size  # 64
    batch = 256          # batched forward == vmap of the per-sample module
    tile_b = 128

    key = jax.random.PRNGKey(0)
    kx, k1, k2, k3, k4, k5, k6 = jax.random.split(key, 7)

    x = jax.random.normal(kx, (batch, input_size), dtype=jnp.float32)

    # Parameters in torch layout.
    w1_t = (jax.random.normal(k1, (hidden, input_size), jnp.float32)
            / jnp.sqrt(input_size))                       # fc1.weight (out, in)
    b1_t = jax.random.normal(k2, (hidden,), jnp.float32) * 0.1
    wconv = (jax.random.normal(
        k3, (out_channels, in_channels, kernel_size, kernel_size),
        jnp.float32) / jnp.sqrt(hidden))                  # conv2.weight
    bconv = jax.random.normal(k4, (out_channels,), jnp.float32) * 0.1
    w3_t = (jax.random.normal(k5, (1, out_channels), jnp.float32)
            / jnp.sqrt(out_channels))                     # fc3.weight (1, C_out)
    b3_t = jax.random.normal(k6, (1,), jnp.float32) * 0.1

    # --- kernel operand prep: fold conv into a dense matmul, lane-pad to 128,
    #     bf16 matmul operands, pack small f32 vectors into one buffer.
    HP = CP = LANE
    w1p = (jnp.zeros((input_size, HP), jnp.float32)
           .at[:, :hidden].set(w1_t.T).astype(jnp.bfloat16))
    # conv weight flattened row-major over (C_in, k, k) matches torch's reshape
    wc_flat = wconv.reshape(out_channels, hidden).T       # (hidden, C_out)
    wcp = (jnp.zeros((HP, CP), jnp.float32)
           .at[:hidden, :out_channels].set(wc_flat).astype(jnp.bfloat16))
    biases = jnp.zeros((3, CP), jnp.float32)
    biases = biases.at[0, :hidden].set(b1_t)
    biases = biases.at[1, :out_channels].set(bconv)
    biases = biases.at[2, :out_channels].set(w3_t[0])
    b3 = b3_t.reshape(1, 1)
    x_bf = x.astype(jnp.bfloat16)

    y = convnet_forward(x_bf, w1p, wcp, biases, b3, tile_b=tile_b)
    y = jax.block_until_ready(y)
    assert y.shape == (batch, 1)

    # Reference 1: same rounding points as the kernel (bf16 operands, f32 accum).
    xf, w1f, wcf = (x_bf.astype(jnp.float32), w1p.astype(jnp.float32),
                    wcp.astype(jnp.float32))
    h1 = jnp.maximum(xf @ w1f + biases[0:1], 0.0)
    h2 = jnp.maximum(h1.astype(jnp.bfloat16).astype(jnp.float32) @ wcf
                     + biases[1:2], 0.0)
    y_ref = jnp.sum(h2 * biases[2:3], axis=-1, keepdims=True) + b3
    assert jnp.allclose(y, y_ref, atol=5e-3, rtol=5e-3), float(
        jnp.max(jnp.abs(y - y_ref)))

    # Reference 2: pure f32 module semantics (loose tolerance for bf16 operands).
    h1f = jnp.maximum(x @ w1_t.T + b1_t[None, :], 0.0)
    h2f = jnp.maximum(h1f @ wconv.reshape(out_channels, hidden).T
                      + bconv[None, :], 0.0)
    yf = h2f @ w3_t.T + b3_t[None, :]
    assert jnp.allclose(y, yf, atol=0.25, rtol=0.05), float(
        jnp.max(jnp.abs(y - yf)))

    print("KERNEL_OK")
</pallas_src>

<mosaic_0001>
module attributes {stable_mosaic.version = 11 : i64} {
  func.func @convnet_kernel(%arg0: i32, %arg1: memref<128x32xbf16, #tpu.memory_space<vmem>>, %arg2: memref<32x128xbf16, #tpu.memory_space<vmem>>, %arg3: memref<128x128xbf16, #tpu.memory_space<vmem>>, %arg4: memref<3x128xf32, #tpu.memory_space<vmem>>, %arg5: memref<1x1xf32, #tpu.memory_space<smem>>, %arg6: memref<128x1xf32, #tpu.memory_space<vmem>>) attributes {dimension_semantics = [#tpu.dimension_semantics<parallel>], iteration_bounds = array<i64: 2>, scalar_prefetch = 0 : i64, scratch_operands = 0 : i64, tpu.core_type = #tpu.core_type<tc>, window_params = [{transform_indices = @transform_0, window_bounds = array<i64: 128, 32>}, {pipeline_mode = #tpu.pipeline_mode<synchronous>, transform_indices = @transform_1, window_bounds = array<i64: 32, 128>}, {pipeline_mode = #tpu.pipeline_mode<synchronous>, transform_indices = @transform_2, window_bounds = array<i64: 128, 128>}, {pipeline_mode = #tpu.pipeline_mode<synchronous>, transform_indices = @transform_3, window_bounds = array<i64: 3, 128>}, {transform_indices = @transform_4, window_bounds = array<i64: 1, 1>}, {transform_indices = @transform_5, window_bounds = array<i64: 128, 1>}]} {
    %c0 = arith.constant 0 : index
    %c0_0 = arith.constant 0 : index
    %0 = vector.load %arg4[%c0, %c0_0] : memref<3x128xf32, #tpu.memory_space<vmem>>, vector<1x128xf32>
    %c1 = arith.constant 1 : index
    %c0_1 = arith.constant 0 : index
    %1 = vector.load %arg4[%c1, %c0_1] : memref<3x128xf32, #tpu.memory_space<vmem>>, vector<1x128xf32>
    %c2 = arith.constant 2 : index
    %c0_2 = arith.constant 0 : index
    %2 = vector.load %arg4[%c2, %c0_2] : memref<3x128xf32, #tpu.memory_space<vmem>>, vector<1x128xf32>
    %c0_3 = arith.constant 0 : index
    %c0_4 = arith.constant 0 : index
    %3 = memref.load %arg5[%c0_3, %c0_4] : memref<1x1xf32, #tpu.memory_space<smem>>
    %c0_5 = arith.constant 0 : index
    %c0_6 = arith.constant 0 : index
    %4 = vector.load %arg1[%c0_5, %c0_6] : memref<128x32xbf16, #tpu.memory_space<vmem>>, vector<128x32xbf16>
    %c0_7 = arith.constant 0 : index
    %c0_8 = arith.constant 0 : index
    %5 = vector.load %arg2[%c0_7, %c0_8] : memref<32x128xbf16, #tpu.memory_space<vmem>>, vector<32x128xbf16>
    %cst = arith.constant dense<0.000000e+00> : vector<128x128xf32>
    %6 = tpu.matmul %4, %5, %cst {dimension_numbers = #tpu.dot_dimension_numbers<[1], [0], [0], [1], [0, 0, 1, 1], [], []>} : vector<128x32xbf16>, vector<32x128xbf16>, vector<128x128xf32> -> vector<128x128xf32>
    %7 = vector.broadcast %0 : vector<1x128xf32> to vector<128x128xf32>
    %8 = arith.addf %6, %7 : vector<128x128xf32>
    %cst_9 = arith.constant 0.000000e+00 : f32
    %9 = vector.broadcast %cst_9 : f32 to vector<128x128xf32>
    %10 = arith.maximumf %8, %9 : vector<128x128xf32>
    %11 = arith.truncf %10 : vector<128x128xf32> to vector<128x128xbf16>
    %c0_10 = arith.constant 0 : index
    %c0_11 = arith.constant 0 : index
    %12 = vector.load %arg3[%c0_10, %c0_11] : memref<128x128xbf16, #tpu.memory_space<vmem>>, vector<128x128xbf16>
    %cst_12 = arith.constant dense<0.000000e+00> : vector<128x128xf32>
    %13 = tpu.matmul %11, %12, %cst_12 {dimension_numbers = #tpu.dot_dimension_numbers<[1], [0], [0], [1], [0, 0, 1, 1], [], []>} : vector<128x128xbf16>, vector<128x128xbf16>, vector<128x128xf32> -> vector<128x128xf32>
    %14 = vector.broadcast %1 : vector<1x128xf32> to vector<128x128xf32>
    %15 = arith.addf %13, %14 : vector<128x128xf32>
    %cst_13 = arith.constant 0.000000e+00 : f32
    %16 = vector.broadcast %cst_13 : f32 to vector<128x128xf32>
    %17 = arith.maximumf %15, %16 : vector<128x128xf32>
    %18 = vector.broadcast %2 : vector<1x128xf32> to vector<128x128xf32>
    %19 = arith.mulf %17, %18 : vector<128x128xf32>
    %cst_14 = arith.constant dense<0.000000e+00> : vector<128xf32>
    %20 = vector.multi_reduction <add>, %19, %cst_14 [1] : vector<128x128xf32> to vector<128xf32>
    %21 = vector.shape_cast %20 : vector<128xf32> to vector<128x1xf32>
    %22 = vector.broadcast %3 : f32 to vector<128x1xf32>
    %23 = arith.addf %21, %22 : vector<128x1xf32>
    %c0_15 = arith.constant 0 : index
    %c0_16 = arith.constant 0 : index
    %24 = vector.load %arg6[%c0_15, %c0_16] : memref<128x1xf32, #tpu.memory_space<vmem>>, vector<128x1xf32>
    tpu.vector_store %arg6[%c0_15, %c0_16], %23 {strides = array<i32>} : memref<128x1xf32, #tpu.memory_space<vmem>>, vector<128x1xf32>,
    return
  }
  func.func @transform_0(%arg0: i32) -> (i32, i32) {
    %c0_i32 = arith.constant 0 : i32
    %c0_i32_0 = arith.constant 0 : i32
    return %arg0, %c0_i32 : i32, i32
  }
  func.func @transform_1(%arg0: i32) -> (i32, i32) {
    %c0_i32 = arith.constant 0 : i32
    %c0_i32_0 = arith.constant 0 : i32
    %c0_i32_1 = arith.constant 0 : i32
    return %c0_i32, %c0_i32_0 : i32, i32
  }
  func.func @transform_2(%arg0: i32) -> (i32, i32) {
    %c0_i32 = arith.constant 0 : i32
    %c0_i32_0 = arith.constant 0 : i32
    %c0_i32_1 = arith.constant 0 : i32
    return %c0_i32, %c0_i32_0 : i32, i32
  }
  func.func @transform_3(%arg0: i32) -> (i32, i32) {
    %c0_i32 = arith.constant 0 : i32
    %c0_i32_0 = arith.constant 0 : i32
    %c0_i32_1 = arith.constant 0 : i32
    return %c0_i32, %c0_i32_0 : i32, i32
  }
  func.func @transform_4(%arg0: i32) -> (i32, i32) {
    %c0_i32 = arith.constant 0 : i32
    %c0_i32_0 = arith.constant 0 : i32
    %c0_i32_1 = arith.constant 0 : i32
    return %c0_i32, %c0_i32_0 : i32, i32
  }
  func.func @transform_5(%arg0: i32) -> (i32, i32) {
    %c0_i32 = arith.constant 0 : i32
    %c0_i32_0 = arith.constant 0 : i32
    return %arg0, %c0_i32 : i32, i32
  }
}

</mosaic_0001>

<bundles_post_ra>
// kernel: tpu_custom_call.1
= control target key start
LH: loop header
LB: loop body
LE: loop exit
PB: predicated region body
PF: predicated region fallthrough
CT: control target
= control target key end

     0   :  { %s980_s20 = smov 0   ;;  %s1128_s0 = inlined_call_operand.vmem [shape: bf16[256,32], index: 0, kind: input, shape index: {}]   ;;  %s1129_s1 = inlined_call_operand.vmem [shape: bf16[32,128], index: 1, kind: input, shape index: {}]   ;;  %s1130_s2 = inlined_call_operand.vmem [shape: bf16[128,128], index: 2, kind: input, shape index: {}]   ;;  %s1131_s3 = inlined_call_operand.vmem [shape: f32[3,128], index: 3, kind: input, shape index: {}]   ;;  %s1132_s4 = inlined_call_operand.<no memory space> [shape: f32[1,1], index: 4, kind: input, shape index: {}]   ;;  %s1133_s5 = inlined_call_operand.vmem [shape: f32[256,1], index: 5, kind: output, shape index: {}]  }
   0x1   :  { %10 = sst [smem:[#allocation2]] %s1132_s4 }
   0x2 LB: > { %s779_s21 = sadd.s32 4294967295, %s945_s20   ;;  %p783_p0 = scmp.ge.s32.totalorder %s945_s20, 1  ;;  %s945_s20 = sphi %s980_s20, %s16_s20  }
   0x3   : > { %p189_p1 = scmp.lt.s32.totalorder %s945_s20, 3 }
   0x5   : > { %p190_p2 = pnand %p783_p0, %p189_p1 }
   0x6   : > { %v921_v0 = vld [vmem:[%s1129_s1] sm:$0xff] (!%p190_p2)   ;;  %s784_s4 = sshll.u32 (!%p190_p2), %s779_s21, 4  ;;  %v922_v1 = vld [vmem:[%s1129_s1 + $0x8] sm:$0xff] (!%p190_p2)   ;;  %vm310_vm0 = vcmask (!%p190_p2), 261120   ;;  %v933_v4 = vld [vmem:[%s1130_s2 + $0x10] sm:$0xff] (!%p190_p2)   ;;  %s233_s28 = sld [smem:[#allocation2]] (!%p190_p2) }
   0x7   : > { %193 = sbr.rel (%p190_p2) target bundleno = 635 (0x27b), region = 40  ;;  %p218_p3 = scmp.lt.s32.totalorder (!%p190_p2), %s784_s4, 31  ;;  %845 = vmatprep.subr.bf16.mxu0 (!%p190_p2), %v921_v0  ;;  %v931_v2 = vld [vmem:[%s1130_s2] sm:$0xff] (!%p190_p2)   ;;  %v932_v3 = vld [vmem:[%s1130_s2 + $0x8] sm:$0xff] (!%p190_p2)   ;;  %v934_v8 = vld [vmem:[%s1130_s2 + $0x18] sm:$0xff] (!%p190_p2)   ;;  %vm706_vm1 = vcmask (!%p190_p2), 7168  }
   0x8   : > { %846 = vmatpush3.bf16.msra.mxu0 (!%p190_p2), %v921_v0  ;;  %897 = vmatprep.subr.bf16.mxu1 (!%p190_p2), %v931_v2  ;;  %v935_v10 = vld [vmem:[%s1130_s2 + $0x20] sm:$0xff] (!%p190_p2)   ;;  %v936_v12 = vld [vmem:[%s1130_s2 + $0x28] sm:$0xff] (!%p190_p2)   ;;  %v937_v16 = vld [vmem:[%s1130_s2 + $0x30] sm:$0xff] (!%p190_p2)  }
   0x9   : > { %847 = vmatprep.subr.bf16.mxu0 (!%p190_p2), %v922_v1  ;;  %905 = vmatpush3.bf16.msra.mxu1 (!%p190_p2), %v931_v2  ;;  %v938_v17 = vld [vmem:[%s1130_s2 + $0x38] sm:$0xff] (!%p190_p2)   ;;  %v788_v18 = vld [vmem:[%s1131_s3] ss:$0 sm:$0xff] (!%p190_p2) }
   0xa   : > { %898 = vmatprep.subr.bf16.mxu1 (!%p190_p2), %v932_v3 }
   0xc   : > { %848 = vmatpush3.bf16.msra.mxu0 (!%p190_p2), %v922_v1 }
   0xd   : > { %865 = vmatprep.subr.bf16.mxu0 (!%p190_p2), %v931_v2  ;;  %906 = vmatpush3.bf16.msra.mxu1 (!%p190_p2), %v932_v3 }
   0xe   : > { %s1135_s4 = smov (!%p218_p3, %s784_s4), 31  ;;  %899 = vmatprep.subr.bf16.mxu1 %v933_v4 }
   0xf   : > { %s785_s30 = sshll.u32 %s1135_s4, 2  ;;  %s787_s29 = sshll.u32 %s1135_s4, 3 }
  0x10   : > { %s1006_s8 = scalar_lea.vmem %s1128_s0, %s785_s30  ;;  %s1091_s7 = scalar_lea.vmem %s1133_s5, %s787_s29 }
  0x11   : > { %v923_v5 = vld [vmem:[%s1006_s8] sm:$0xff]   ;;  %v924_v6 = vld [vmem:[%s1006_s8 + $0x8] sm:$0xff]   ;;  %v925_v7 = vld [vmem:[%s1006_s8 + $0x10] sm:$0xff]   ;;  %907 = vmatpush3.bf16.msra.mxu1 %v933_v4 }
  0x12   : > { %849 = vmatprep.mubr.msk.bf16.mxu0 %vm310_vm0, %v923_v5  ;;  %v926_v9 = vld [vmem:[%s1006_s8 + $0x18] sm:$0xff]   ;;  %900 = vmatprep.subr.bf16.mxu1 %v934_v8  ;;  %v927_v11 = vld [vmem:[%s1006_s8 + $0x20] sm:$0xff]   ;;  %v928_v13 = vld [vmem:[%s1006_s8 + $0x28] sm:$0xff]  }
  0x13   : > { %850 = vmatmul.mubr.msk.bf16.vlgmr.msra.gmra.mrb[0].mxu0 %vm310_vm0, %v924_v6  ;;  %v929_v14 = vld [vmem:[%s1006_s8 + $0x30] sm:$0xff]   ;;  %v930_v15 = vld [vmem:[%s1006_s8 + $0x38] sm:$0xff]  }
  0x14   : > { %853 = vmatprep.mubr.msk.bf16.mxu0 %vm310_vm0, %v925_v7  ;;  %866 = vmatpush3.bf16.msra.mxu0 %v931_v2 }
  0x15   : > { %867 = vmatprep.subr.bf16.mxu0 %v932_v3  ;;  %908 = vmatpush3.bf16.msra.mxu1 %v934_v8 }
  0x16   : > { %901 = vmatprep.subr.bf16.mxu1 %v935_v10 }
  0x18   : > { %868 = vmatpush3.bf16.msra.mxu0 %v932_v3 }
  0x19   : > { %869 = vmatprep.subr.bf16.mxu0 %v933_v4  ;;  %909 = vmatpush3.bf16.msra.mxu1 %v935_v10 }
  0x1a   : > { %902 = vmatprep.subr.bf16.mxu1 %v936_v12 }
  0x1b   : > { %854 = vmatmul.mubr.msk.bf16.gmra.mrb[4].mxu0 %vm310_vm0, %v926_v9 }
  0x1c   : > { %857 = vmatprep.mubr.msk.bf16.mxu0 %vm310_vm0, %v927_v11  ;;  %870 = vmatpush3.bf16.msra.mxu0 %v933_v4  ;;  %v1048_v11 = vld [vmem:[%s1131_s3 + $0x1] ss:$0 sm:$0xff] }
  0x1d   : > { %871 = vmatprep.subr.bf16.mxu0 %v934_v8  ;;  %910 = vmatpush3.bf16.msra.mxu1 %v936_v12 }
  0x1e   : > { %903 = vmatprep.subr.bf16.mxu1 %v937_v16 }
  0x20   : > { %872 = vmatpush3.bf16.msra.mxu0 %v934_v8 }
  0x21   : > { %873 = vmatprep.subr.bf16.mxu0 %v935_v10  ;;  %911 = vmatpush3.bf16.msra.mxu1 %v937_v16 }
  0x22   : > { %904 = vmatprep.subr.bf16.mxu1 %v938_v17 }
  0x23   : > { %858 = vmatmul.mubr.msk.bf16.gmra.mrb[8].mxu0 %vm310_vm0, %v928_v13 }
  0x24   : > { %861 = vmatprep.mubr.msk.bf16.mxu0 %vm310_vm0, %v929_v14  ;;  %874 = vmatpush3.bf16.msra.mxu0 %v935_v10 }
  0x25   : > { %875 = vmatprep.subr.bf16.mxu0 %v936_v12  ;;  %912 = vmatpush3.bf16.msra.mxu1 %v938_v17 }
  0x28   : > { %876 = vmatpush3.bf16.msra.mxu0 %v936_v12 }
  0x29   : > { %877 = vmatprep.subr.bf16.mxu0 %v937_v16 }
  0x2b   : > { %862 = vmatmul.mubr.msk.bf16.gmra.mrb[12].mxu0 %vm310_vm0, %v930_v15 }
  0x2c   : > { %878 = vmatpush3.bf16.msra.mxu0 %v937_v16 }
  0x2d   : > { %879 = vmatprep.subr.bf16.mxu0 %v938_v17 }
  0x30   : > { %880 = vmatpush3.bf16.msra.mxu0 %v938_v17  ;;  %v1055_v17 = vld [vmem:[%s1131_s3 + $0x2] ss:$0 sm:$0xff] }
  0xe6   : > { %v851_v19 = vpop.f32.mrb[0].mxu0 }
  0xe7   : > { %v378_v20 = vadd.f32 %v851_v19, %v788_v18  ;;  %v369_v21 = vpop.f32.mrb[1].mxu0 }
  0xe8   : > { %v370_v22 = vadd.f32 %v788_v18, %v369_v21  ;;  %v852_v23 = vpop.f32.mrb[2].mxu0 }
  0xe9   : > { %v381_v24 = vadd.f32 %v852_v23, %v788_v18  ;;  %v372_v25 = vpop.f32.mrb[3].mxu0  ;;  %v434_v27 = vmax.f32 %v378_v20, 0.0 }
  0xea   : > { %v373_v26 = vadd.f32 %v788_v18, %v372_v25  ;;  %v432_v29 = vmax.f32 %v370_v22, 0.0 }
  0xeb   : > { %v435_v28 = vmax.f32 %v381_v24, 0.0 }
  0xec   : > { %v433_v30 = vmax.f32 %v373_v26, 0.0 }
  0xed   : > { %v449_v31 = vpack.c.bf16 %v435_v28, %v434_v27 }
  0xee   : > { %v448_v32 = vpack.c.bf16 %v433_v30, %v432_v29  ;;  %v855_v33 = vpop.f32.mrb[4].mxu0 }
  0xef   : > { %v394_v34 = vadd.f32 %v855_v33, %v788_v18  ;;  %v385_v35 = vpop.f32.mrb[5].mxu0 }
  0xf0   : > { %v386_v36 = vadd.f32 %v788_v18, %v385_v35  ;;  %v856_v37 = vpop.f32.mrb[6].mxu0  ;;  %881 = vmatprep.mubr.bf16.mxu0 %v448_v32 }
  0xf1   : > { %v397_v38 = vadd.f32 %v856_v37, %v788_v18  ;;  %v388_v39 = vpop.f32.mrb[7].mxu0  ;;  %882 = vmatmul.mubr.bf16.vlgmr.msra.gmra.mrb[16].mxu0 %v449_v31  ;;  %v438_v41 = vmax.f32 %v394_v34, 0.0 }
  0xf2   : > { %v389_v40 = vadd.f32 %v788_v18, %v388_v39  ;;  %v436_v43 = vmax.f32 %v386_v36, 0.0 }
  0xf3   : > { %v439_v42 = vmax.f32 %v397_v38, 0.0 }
  0xf4   : > { %v437_v44 = vmax.f32 %v389_v40, 0.0 }
  0xf5   : > { %v451_v45 = vpack.c.bf16 %v439_v42, %v438_v41 }
  0xf6   : > { %v859_v46 = vpop.f32.mrb[8].mxu0  ;;  %v450_v47 = vpack.c.bf16 %v437_v44, %v436_v43 }
  0xf7   : > { %v410_v48 = vadd.f32 %v859_v46, %v788_v18  ;;  %v401_v49 = vpop.f32.mrb[9].mxu0 }
  0xf8   : > { %v402_v50 = vadd.f32 %v788_v18, %v401_v49  ;;  %v860_v51 = vpop.f32.mrb[10].mxu0  ;;  %885 = vmatprep.mubr.bf16.mxu1 %v450_v47 }
  0xf9   : > { %v413_v52 = vadd.f32 %v860_v51, %v788_v18  ;;  %v404_v53 = vpop.f32.mrb[11].mxu0  ;;  %886 = vmatmul.mubr.bf16.vlgmr.msra.gmra.mrb[0].mxu1 %v451_v45  ;;  %v442_v55 = vmax.f32 %v410_v48, 0.0 }
  0xfa   : > { %v405_v54 = vadd.f32 %v788_v18, %v404_v53  ;;  %v440_v57 = vmax.f32 %v402_v50, 0.0 }
  0xfb   : > { %v443_v56 = vmax.f32 %v413_v52, 0.0 }
  0xfc   : > { %v441_v58 = vmax.f32 %v405_v54, 0.0 }
  0xfd   : > { %v453_v59 = vpack.c.bf16 %v443_v56, %v442_v55 }
  0xfe   : > { %v452_v60 = vpack.c.bf16 %v441_v58, %v440_v57  ;;  %v863_v61 = vpop.f32.mrb[12].mxu0 }
  0xff   : > { %v426_v62 = vadd.f32 %v863_v61, %v788_v18  ;;  %v417_v63 = vpop.f32.mrb[13].mxu0 }
 0x100   : > { %v418_v0 = vadd.f32 %v788_v18, %v417_v63  ;;  %v864_v1 = vpop.f32.mrb[14].mxu0  ;;  %889 = vmatprep.mubr.bf16.mxu1 %v452_v60 }
 0x101   : > { %v429_v2 = vadd.f32 %v864_v1, %v788_v18  ;;  %v420_v3 = vpop.f32.mrb[15].mxu0  ;;  %890 = vmatmul.mubr.bf16.gmra.mrb[4].mxu1 %v453_v59  ;;  %v446_v5 = vmax.f32 %v426_v62, 0.0 }
 0x102   : > { %v421_v4 = vadd.f32 %v788_v18, %v420_v3  ;;  %v444_v7 = vmax.f32 %v418_v0, 0.0 }
 0x103   : > { %v447_v6 = vmax.f32 %v429_v2, 0.0 }
 0x104   : > { %v445_v8 = vmax.f32 %v421_v4, 0.0 }
 0x105   : > { %v455_v9 = vpack.c.bf16 %v447_v6, %v446_v5 }
 0x106   : > { %v454_v10 = vpack.c.bf16 %v445_v8, %v444_v7 }
 0x108   : > { %893 = vmatprep.mubr.bf16.mxu1 %v454_v10 }
 0x109   : > { %894 = vmatmul.mubr.bf16.gmra.mrb[8].mxu1 %v455_v9 }
 0x1c4   : > { %v883_v12 = vpop.f32.mrb[16].mxu0 }
 0x1c5   : > { %v567_v13 = vadd.f32 %v883_v12, %v1048_v11  ;;  %v558_v14 = vpop.f32.mrb[17].mxu0 }
 0x1c6   : > { %v559_v15 = vadd.f32 %v1048_v11, %v558_v14  ;;  %v884_v16 = vpop.f32.mrb[18].mxu0 }
 0x1c7   : > { %v623_v18 = vmax.f32 %v567_v13, 0.0  ;;  %v570_v19 = vadd.f32 %v884_v16, %v1048_v11  ;;  %v561_v20 = vpop.f32.mrb[19].mxu0 }
 0x1c8   : > { %v621_v21 = vmax.f32 %v559_v15, 0.0  ;;  %v562_v22 = vadd.f32 %v1048_v11, %v561_v20 }
 0x1c9   : > { %v624_v23 = vmax.f32 %v570_v19, 0.0  ;;  %v643_v24 = vmul.f32 %v1055_v17, %v623_v18 }
 0x1ca   : > { %v622_v25 = vmax.f32 %v562_v22, 0.0  ;;  %v641_v26 = vmul.f32 %v1055_v17, %v621_v21 }
 0x1cb   : > { %661 = vadd.xlane.f32.xlu1 %v643_v24  ;;  %v644_v30 = vmul.f32 %v1055_v17, %v624_v23 }
 0x1cc   : > { %v887_v27 = vpop.f32.mrb[0].mxu1  ;;  %657 = vadd.xlane.f32.xlu0 %v641_v26  ;;  %v642_v33 = vmul.f32 %v1055_v17, %v622_v25 }
 0x1cd   : > { %v583_v28 = vadd.f32 %v887_v27, %v1048_v11  ;;  %v574_v29 = vpop.f32.mrb[1].mxu1 }
 0x1ce   : > { %v575_v31 = vadd.f32 %v1048_v11, %v574_v29  ;;  %v888_v32 = vpop.f32.mrb[2].mxu1 }
 0x1cf   : > { %v627_v34 = vmax.f32 %v583_v28, 0.0  ;;  %v586_v35 = vadd.f32 %v888_v32, %v1048_v11  ;;  %v577_v36 = vpop.f32.mrb[3].mxu1  ;;  %663 = vadd.xlane.f32.xlu1 %v644_v30 }
 0x1d0   : > { %v578_v37 = vadd.f32 %v1048_v11, %v577_v36  ;;  %659 = vadd.xlane.f32.xlu0 %v642_v33  ;;  %v625_v40 = vmax.f32 %v575_v31, 0.0 }
 0x1d1   : > { %v628_v38 = vmax.f32 %v586_v35, 0.0  ;;  %v647_v39 = vmul.f32 %v1055_v17, %v627_v34 }
 0x1d2   : > { %v626_v41 = vmax.f32 %v578_v37, 0.0  ;;  %v645_v48 = vmul.f32 %v1055_v17, %v625_v40 }
 0x1d3   : > { %v648_v42 = vmul.f32 %v1055_v17, %v628_v38 }
 0x1d4   : > { %v891_v43 = vpop.f32.mrb[4].mxu1  ;;  %669 = vadd.xlane.f32.xlu0 %v647_v39  ;;  %v646_v52 = vmul.f32 %v1055_v17, %v626_v41 }
 0x1d5   : > { %v599_v44 = vadd.f32 %v891_v43, %v1048_v11  ;;  %v590_v45 = vpop.f32.mrb[5].mxu1  ;;  %671 = vadd.xlane.f32.xlu1 %v648_v42 }
 0x1d6   : > { %v591_v46 = vadd.f32 %v1048_v11, %v590_v45  ;;  %v892_v47 = vpop.f32.mrb[6].mxu1 }
 0x1d7   : > { %v631_v49 = vmax.f32 %v599_v44, 0.0  ;;  %v602_v50 = vadd.f32 %v892_v47, %v1048_v11  ;;  %v593_v51 = vpop.f32.mrb[7].mxu1 }
 0x1d8   : > { %v594_v53 = vadd.f32 %v1048_v11, %v593_v51  ;;  %665 = vadd.xlane.f32.xlu0 %v645_v48  ;;  %v629_v56 = vmax.f32 %v591_v46, 0.0 }
 0x1d9   : > { %v632_v54 = vmax.f32 %v602_v50, 0.0  ;;  %667 = vadd.xlane.f32.xlu1 %v646_v52  ;;  %v651_v55 = vmul.f32 %v1055_v17, %v631_v49 }
 0x1da   : > { %v630_v57 = vmax.f32 %v594_v53, 0.0  ;;  %v649_v0 = vmul.f32 %v1055_v17, %v629_v56 }
 0x1db   : > { %v652_v58 = vmul.f32 %v1055_v17, %v632_v54 }
 0x1dc   : > { %v895_v59 = vpop.f32.mrb[8].mxu1  ;;  %677 = vadd.xlane.f32.xlu0 %v651_v55  ;;  %v650_v2 = vmul.f32 %v1055_v17, %v630_v57 }
 0x1dd   : > { %v606_v60 = vpop.f32.mrb[9].mxu1  ;;  %679 = vadd.xlane.f32.xlu1 %v652_v58  ;;  %v615_v61 = vadd.f32 %v895_v59, %v1048_v11 }
 0x1de   : > { %v607_v62 = vadd.f32 %v1048_v11, %v606_v60  ;;  %v896_v63 = vpop.f32.mrb[10].mxu1 }
 0x1df   : > { %v609_v1 = vpop.f32.mrb[11].mxu1  ;;  %v618_v4 = vadd.f32 %v896_v63, %v1048_v11  ;;  %v635_v6 = vmax.f32 %v615_v61, 0.0 }
 0x1e0   : > { %v633_v3 = vmax.f32 %v607_v62, 0.0  ;;  %v610_v5 = vadd.f32 %v1048_v11, %v609_v1  ;;  %673 = vadd.xlane.f32.xlu0 %v649_v0  ;;  %v689_v11 = vstv %s233_s28 }
 0x1e1   : > { %675 = vadd.xlane.f32.xlu1 %v650_v2  ;;  %v636_v9 = vmax.f32 %v618_v4, 0.0  ;;  %v655_v12 = vmul.f32 %v1055_v17, %v635_v6 }
 0x1e2   : > { %v634_v7 = vmax.f32 %v610_v5, 0.0  ;;  %v653_v8 = vmul.f32 %v1055_v17, %v633_v3 }
 0x1e3   : > { %v656_v13 = vmul.f32 %v1055_v17, %v636_v9 }
 0x1e4   : > { %681 = vadd.xlane.f32.xlu0 %v653_v8  ;;  %v654_v10 = vmul.f32 %v1055_v17, %v634_v7 }
 0x1e6   : > { %683 = vadd.xlane.f32.xlu1 %v654_v10 }
 0x1e8   : > { %685 = vadd.xlane.f32.xlu0 %v655_v12 }
 0x1ea   : > { %687 = vadd.xlane.f32.xlu1 %v656_v13 }
 0x258   : > { %v662_v14 = vpop.xlane.xlu1 %661 }
 0x259   : > { %v692_v15 = vadd.f32 %v689_v11, %v662_v14  ;;  %v658_v16 = vpop.xlane.xlu0 %657 }
 0x25a   : > { %v690_v17 = vadd.f32 %v689_v11, %v658_v16 }
 0x25b   : > { %709 = vst.msk [vmem:[%s1091_s7 + $0x10] sm:$0xff] %vm706_vm1, %v692_v15 }
 0x25c   : > { %707 = vst.msk [vmem:[%s1091_s7] sm:$0xff] %vm706_vm1, %v690_v17  ;;  %v664_v18 = vpop.xlane.xlu1 %663 }
 0x25d   : > { %v693_v19 = vadd.f32 %v689_v11, %v664_v18  ;;  %v660_v20 = vpop.xlane.xlu0 %659 }
 0x25e   : > { %v691_v21 = vadd.f32 %v689_v11, %v660_v20 }
 0x25f   : > { %710 = vst.msk [vmem:[%s1091_s7 + $0x18] sm:$0xff] %vm706_vm1, %v693_v19 }
 0x260   : > { %708 = vst.msk [vmem:[%s1091_s7 + $0x8] sm:$0xff] %vm706_vm1, %v691_v21 }
 0x261   : > { %v670_v22 = vpop.xlane.xlu0 %669 }
 0x262   : > { %v696_v23 = vadd.f32 %v689_v11, %v670_v22  ;;  %v672_v24 = vpop.xlane.xlu1 %671 }
 0x263   : > { %v697_v25 = vadd.f32 %v689_v11, %v672_v24 }
 0x264   : > { %713 = vst.msk [vmem:[%s1091_s7 + $0x30] sm:$0xff] %vm706_vm1, %v696_v23 }
 0x265   : > { %714 = vst.msk [vmem:[%s1091_s7 + $0x38] sm:$0xff] %vm706_vm1, %v697_v25  ;;  %v666_v26 = vpop.xlane.xlu0 %665 }
 0x266   : > { %v694_v27 = vadd.f32 %v689_v11, %v666_v26  ;;  %v668_v28 = vpop.xlane.xlu1 %667 }
 0x267   : > { %v695_v29 = vadd.f32 %v689_v11, %v668_v28 }
 0x268   : > { %711 = vst.msk [vmem:[%s1091_s7 + $0x20] sm:$0xff] %vm706_vm1, %v694_v27 }
 0x269   : > { %712 = vst.msk [vmem:[%s1091_s7 + $0x28] sm:$0xff] %vm706_vm1, %v695_v29  ;;  %v678_v30 = vpop.xlane.xlu0 %677 }
 0x26a   : > { %v700_v31 = vadd.f32 %v689_v11, %v678_v30  ;;  %v680_v32 = vpop.xlane.xlu1 %679 }
 0x26b   : > { %v701_v33 = vadd.f32 %v689_v11, %v680_v32 }
 0x26c   : > { %717 = vst.msk [vmem:[%s1091_s7 + $0x50] sm:$0xff] %vm706_vm1, %v700_v31 }
 0x26d   : > { %718 = vst.msk [vmem:[%s1091_s7 + $0x58] sm:$0xff] %vm706_vm1, %v701_v33  ;;  %v674_v34 = vpop.xlane.xlu0 %673 }
 0x26e   : > { %v698_v35 = vadd.f32 %v689_v11, %v674_v34  ;;  %v676_v36 = vpop.xlane.xlu1 %675 }
 0x26f   : > { %v699_v37 = vadd.f32 %v689_v11, %v676_v36 }
 0x270   : > { %715 = vst.msk [vmem:[%s1091_s7 + $0x40] sm:$0xff] %vm706_vm1, %v698_v35 }
 0x271   : > { %716 = vst.msk [vmem:[%s1091_s7 + $0x48] sm:$0xff] %vm706_vm1, %v699_v37  ;;  %v682_v38 = vpop.xlane.xlu0 %681 }
 0x272   : > { %v702_v39 = vadd.f32 %v689_v11, %v682_v38 }
 0x273   : > { %v684_v40 = vpop.xlane.xlu1 %683 }
 0x274   : > { %719 = vst.msk [vmem:[%s1091_s7 + $0x60] sm:$0xff] %vm706_vm1, %v702_v39  ;;  %v703_v41 = vadd.f32 %v689_v11, %v684_v40 }
 0x275   : > { %v686_v42 = vpop.xlane.xlu0 %685 }
 0x276   : > { %720 = vst.msk [vmem:[%s1091_s7 + $0x68] sm:$0xff] %vm706_vm1, %v703_v41  ;;  %v704_v43 = vadd.f32 %v689_v11, %v686_v42 }
 0x277   : > { %v688_v44 = vpop.xlane.xlu1 %687 }
 0x278   : > { %721 = vst.msk [vmem:[%s1091_s7 + $0x70] sm:$0xff] %vm706_vm1, %v704_v43  ;;  %v705_v45 = vadd.f32 %v689_v11, %v688_v44 }
 0x27a   : > { %722 = vst.msk [vmem:[%s1091_s7 + $0x78] sm:$0xff] %vm706_vm1, %v705_v45 }
 0x27b PF: > { %s16_s20 = sadd.s32 1, %s945_s20  }
 0x27c   : > { %p13_p4 = scmp.ge.s32.totalorder %s16_s20, 4  }
 0x27e   :  { %15 = sbr.rel (!%p13_p4) target bundleno = 2 (0x2), region = 70 }

</bundles_post_ra>
